<compile_context>
chip_gen: v6e
topology: v6e:2x2x1
jax: 0.10.0
libtpu: 0.0.40
codegen_flags: <defaults>
</compile_context>

<pallas_src>
import functools
import math

import jax
import jax.numpy as jnp
from jax.experimental import pallas as pl
from jax.experimental.pallas import tpu as pltpu

_INV_SQRT2 = 1.0 / math.sqrt(2.0)


def _gelu_exact_f32(h):
    # Exact erf-based GELU (matches torch.nn.GELU() default), computed in f32.
    return 0.5 * h * (1.0 + jax.lax.erf(h * _INV_SQRT2))


# --------------------------------------------------------------------------------------
# Kernels
# --------------------------------------------------------------------------------------
def _mlp_kernel_resident(x_ref, w1_ref, b1_ref, w2_ref, b2_ref, o_ref):
    """Weights fully VMEM-resident: single fused pass, no accumulator scratch."""
    h = jnp.dot(x_ref[...], w1_ref[...], preferred_element_type=jnp.float32)
    h = _gelu_exact_f32(h + b1_ref[...].astype(jnp.float32))
    # Dropout(p=0.0) == identity.
    y = jnp.dot(h.astype(w2_ref.dtype), w2_ref[...], preferred_element_type=jnp.float32)
    o_ref[...] = (y + b2_ref[...].astype(jnp.float32)).astype(o_ref.dtype)


def _mlp_kernel_slab(x_ref, w1_ref, b1_ref, w2_ref, b2_ref, o_ref, acc_ref):
    """Hidden dim streamed as slabs (reduction axis last), f32 VMEM accumulator.

    First slab writes the accumulator directly (no zero-init + RMW); the last slab
    fuses its partial product and the b2 add straight into o_ref (saves one tm*dim
    f32 store + load per row tile).  The wrapper guarantees >= 2 slabs.
    """
    l = pl.program_id(1)
    nl = pl.num_programs(1)

    h = jnp.dot(x_ref[...], w1_ref[...], preferred_element_type=jnp.float32)
    h = _gelu_exact_f32(h + b1_ref[...].astype(jnp.float32))
    # Dropout(p=0.0) == identity.
    part = jnp.dot(h.astype(w2_ref.dtype), w2_ref[...],
                   preferred_element_type=jnp.float32)

    @pl.when(l == 0)
    def _():
        acc_ref[...] = part

    @pl.when(jnp.logical_and(l > 0, l < nl - 1))
    def _():
        acc_ref[...] += part

    @pl.when(jnp.logical_and(l > 0, l == nl - 1))
    def _():
        o_ref[...] = (acc_ref[...] + part
                      + b2_ref[...].astype(jnp.float32)).astype(o_ref.dtype)


# --------------------------------------------------------------------------------------
# Tiling / budgeting helpers (all trace-time Python)
# --------------------------------------------------------------------------------------
def _round_up(n, m):
    return ((n + m - 1) // m) * m


def _vmem_capacity_bytes():
    """Generation-aware VMEM size; falls back to v7x's 64 MiB (safe lower bound)."""
    try:
        info = pltpu.get_tpu_info()
        cap = getattr(info, "vmem_capacity_bytes", None)
        if cap:
            return int(cap)
    except Exception:
        pass
    return 64 * 1024 * 1024


def _choose_tm(n_rows, tile_m_cap):
    """Multiple-of-8 row tile: as big as possible (amortize per-step overhead, fill the
    MXU rows) subject to <=10% padding waste and >=2 row tiles when possible (so the
    'parallel' row axis spans both v7x TensorCores)."""
    n8 = _round_up(max(n_rows, 1), 8)
    cap = max(8, min(_round_up(max(tile_m_cap, 8), 8), n8))
    if n8 >= 16:
        cap = max(8, min(cap, _round_up((n8 + 1) // 2, 8)))
    cands = list(range(8, cap + 1, 8))

    def waste(c):
        return (_round_up(n8, c) - n8) / n8

    ok = [c for c in cands if waste(c) <= 0.10]
    if ok:
        return max(ok)
    return min(cands, key=lambda c: (waste(c), -c))


def _choose_tl(ldim, dim, tm, w_isz, x_isz, o_isz, budget, tile_l_hint):
    """Largest lane-dense (multiple of 128) divisor of ldim whose double-buffered
    W1/W2/b1 slabs fit the VMEM budget together with the x/out tiles and f32 acc."""
    fixed = (2 * tm * dim * (x_isz + o_isz)   # x + out tiles, double-buffered
             + tm * dim * 4                   # f32 accumulator scratch
             + 2 * dim * 4)                   # b2
    divs = [d for d in range(128, ldim, 128) if ldim % d == 0]
    if not divs:
        return ldim                            # no lane-dense split -> keep resident
    if tile_l_hint is not None:
        capped = [d for d in divs if d <= tile_l_hint]
        if capped:
            divs = capped
    for d in sorted(divs, reverse=True):
        slab = 2 * (2 * dim * d * w_isz + d * 4)   # W1/W2 slabs + b1 slab, double-buffered
        if fixed + slab <= budget:
            return d
    return min(divs)


# --------------------------------------------------------------------------------------
# Public entry point
# --------------------------------------------------------------------------------------
@functools.partial(jax.jit, static_argnames=("tile_m", "tile_l", "cast_to_bf16"))
def mlp_forward(x, w1, b1, w2, b2, *, tile_m=None, tile_l=None, cast_to_bf16=False):
    """x: [B, S, dim] -> [B, S, dim].  tile_m/tile_l=None => auto, generation-aware."""
    B, S, dim = x.shape
    ldim = w1.shape[1]
    N = B * S
    out_dtype = x.dtype

    # Optional bf16 MXU operands (f32 accumulation preserved).  Off by default because
    # it drifts slightly from the exact f32 reference.
    if cast_to_bf16 and x.dtype == jnp.float32:
        x = x.astype(jnp.bfloat16)
        w1 = w1.astype(jnp.bfloat16)
        w2 = w2.astype(jnp.bfloat16)

    x2 = x.reshape(N, dim)
    b1_2 = b1.reshape(1, ldim)
    b2_2 = b2.reshape(1, dim)

    x_isz = x2.dtype.itemsize
    o_isz = jnp.dtype(out_dtype).itemsize
    w_isz = w1.dtype.itemsize

    # Generation-aware VMEM budget (v5e/v6e: 128 MiB, v7x: 64 MiB per TensorCore).
    vmem_cap = _vmem_capacity_bytes()
    vmem_limit = max(32 * 1024 * 1024, int(vmem_cap * 0.85))
    budget = int(vmem_limit * 0.85)

    # Row tile.
    tm = _choose_tm(N, tile_m if tile_m is not None else 512)

    # Mode: weights fully VMEM-resident (fast path) vs. hidden-slab streaming.
    io_bytes = 2 * tm * dim * (x_isz + o_isz)
    resident_bytes = 2 * (2 * dim * ldim * w_isz
                          + ldim * b1.dtype.itemsize + dim * b2.dtype.itemsize)
    user_streams = (tile_l is not None and 0 < tile_l < ldim
                    and ldim % tile_l == 0 and tile_l % 128 == 0)

    if user_streams:
        tl = tile_l
    elif resident_bytes + io_bytes <= budget:
        tl = ldim
    else:
        # Streaming: larger row tiles push per-slab arithmetic intensity over the HBM
        # roofline (important on v7x where weights may not fit its 64 MiB VMEM).
        if tile_m is None:
            tm = _choose_tm(N, 1024)
            io_bytes = 2 * tm * dim * (x_isz + o_isz)
        tl = _choose_tl(ldim, dim, tm, w_isz, x_isz, o_isz, budget, tile_l)

    if tl >= ldim and resident_bytes + io_bytes > budget:
        # Pathological shape with no lane-dense hidden split: allow up to full VMEM.
        vmem_limit = vmem_cap

    Np = _round_up(N, tm)
    if Np != N:
        x2 = jnp.pad(x2, ((0, Np - N), (0, 0)))
    num_row_tiles = Np // tm

    weight_hbm_bytes = (2 * dim * ldim * w_isz
                        + ldim * b1.dtype.itemsize + dim * b2.dtype.itemsize)
    weight_passes = 1 if tl >= ldim else num_row_tiles
    cost = pl.CostEstimate(
        flops=2 * Np * dim * ldim * 2,                 # two matmuls
        transcendentals=Np * ldim,                     # erf per hidden activation
        bytes_accessed=Np * dim * (x_isz + o_isz) + weight_passes * weight_hbm_bytes,
    )

    if tl >= ldim:
        # ---- weights fully resident: 1-D row grid, grid-invariant weight specs -------
        out2 = pl.pallas_call(
            _mlp_kernel_resident,
            out_shape=jax.ShapeDtypeStruct((Np, dim), out_dtype),
            grid_spec=pltpu.PrefetchScalarGridSpec(
                num_scalar_prefetch=0,
                grid=(num_row_tiles,),
                in_specs=[
                    pl.BlockSpec((tm, dim), lambda i: (i, 0)),     # x row tile
                    pl.BlockSpec((dim, ldim), lambda i: (0, 0)),   # W1 (DMA'd once)
                    pl.BlockSpec((1, ldim), lambda i: (0, 0)),     # b1 (DMA'd once)
                    pl.BlockSpec((ldim, dim), lambda i: (0, 0)),   # W2 (DMA'd once)
                    pl.BlockSpec((1, dim), lambda i: (0, 0)),      # b2 (DMA'd once)
                ],
                out_specs=pl.BlockSpec((tm, dim), lambda i: (i, 0)),
            ),
            compiler_params=pltpu.CompilerParams(
                dimension_semantics=("parallel",),
                vmem_limit_bytes=vmem_limit,
            ),
            cost_estimate=cost,
        )(x2, w1, b1_2, w2, b2_2)
    else:
        # ---- hidden-slab streaming: 2-D grid, f32 accumulator, reduction axis last ---
        out2 = pl.pallas_call(
            _mlp_kernel_slab,
            out_shape=jax.ShapeDtypeStruct((Np, dim), out_dtype),
            grid_spec=pltpu.PrefetchScalarGridSpec(
                num_scalar_prefetch=0,
                grid=(num_row_tiles, ldim // tl),
                in_specs=[
                    pl.BlockSpec((tm, dim), lambda i, l: (i, 0)),   # x row tile
                    pl.BlockSpec((dim, tl), lambda i, l: (0, l)),   # W1 hidden slab
                    pl.BlockSpec((1, tl), lambda i, l: (0, l)),     # b1 slab
                    pl.BlockSpec((tl, dim), lambda i, l: (l, 0)),   # W2 hidden slab
                    pl.BlockSpec((1, dim), lambda i, l: (0, 0)),    # b2
                ],
                out_specs=pl.BlockSpec((tm, dim), lambda i, l: (i, 0)),
                scratch_shapes=[pltpu.VMEM((tm, dim), jnp.float32)],
            ),
            compiler_params=pltpu.CompilerParams(
                dimension_semantics=("parallel", "arbitrary"),
                vmem_limit_bytes=vmem_limit,
            ),
            cost_estimate=cost,
        )(x2, w1, b1_2, w2, b2_2)

    if Np != N:
        out2 = out2[:N]
    return out2.reshape(B, S, dim)


# --------------------------------------------------------------------------------------
# Reference / tests
# --------------------------------------------------------------------------------------
def init_params(key, dim, ldim, dtype=jnp.float32):
    """Deterministic parameter init (PyTorch-Linear-style uniform bounds)."""
    k1, k2, k3, k4 = jax.random.split(key, 4)
    bound1 = 1.0 / math.sqrt(dim)
    bound2 = 1.0 / math.sqrt(ldim)
    w1 = jax.random.uniform(k1, (dim, ldim), dtype, -bound1, bound1)
    b1 = jax.random.uniform(k2, (ldim,), dtype, -bound1, bound1)
    w2 = jax.random.uniform(k3, (ldim, dim), dtype, -bound2, bound2)
    b2 = jax.random.uniform(k4, (dim,), dtype, -bound2, bound2)
    return w1, b1, w2, b2


def _reference(x, w1, b1, w2, b2):
    dim = x.shape[-1]
    hp = jax.lax.Precision.HIGHEST
    h = jnp.dot(x.reshape(-1, dim), w1, precision=hp) + b1
    h = _gelu_exact_f32(h)
    return (jnp.dot(h, w2, precision=hp) + b2).reshape(x.shape)


if __name__ == "__main__":
    key = jax.random.PRNGKey(0)

    # --- test 1: small ViT-MLP shapes, weight-resident fast path ----------------------
    B, S, dim, ldim = 2, 8, 32, 64
    kx, kp, kx2, kp2 = jax.random.split(key, 4)
    x = jax.random.normal(kx, (B, S, dim), jnp.float32)
    w1, b1, w2, b2 = init_params(kp, dim, ldim)

    y = jax.block_until_ready(mlp_forward(x, w1, b1, w2, b2))
    y_ref = _reference(x, w1, b1, w2, b2)
    assert jnp.allclose(y, y_ref, atol=1e-5, rtol=1e-5), "mismatch vs reference (test 1)"

    # --- test 2: row padding (N % tile != 0) + forced hidden-slab streaming path ------
    B2, S2, dim2, ldim2 = 1, 50, 128, 256
    x2 = jax.random.normal(kx2, (B2, S2, dim2), jnp.float32)
    w1b, b1b, w2b, b2b = init_params(kp2, dim2, ldim2)

    y2 = jax.block_until_ready(
        mlp_forward(x2, w1b, b1b, w2b, b2b, tile_m=64, tile_l=128))
    y2_ref = _reference(x2, w1b, b1b, w2b, b2b)
    assert jnp.allclose(y2, y2_ref, atol=1e-4, rtol=1e-4), "mismatch vs reference (test 2)"

    # --- test 3: optional bf16 MXU operands (f32 accumulation), looser tolerance ------
    y3 = jax.block_until_ready(
        mlp_forward(x2, w1b, b1b, w2b, b2b, cast_to_bf16=True))
    assert jnp.allclose(y3, y2_ref, atol=3e-2, rtol=3e-2), "mismatch vs reference (test 3)"

    print("KERNEL_OK")
</pallas_src>

<mosaic_0001>
module attributes {stable_mosaic.version = 11 : i64} {
  func.func @_mlp_kernel_resident(%arg0: i32, %arg1: memref<8x32xf32, #tpu.memory_space<vmem>>, %arg2: memref<32x64xf32, #tpu.memory_space<vmem>>, %arg3: memref<1x64xf32, #tpu.memory_space<vmem>>, %arg4: memref<64x32xf32, #tpu.memory_space<vmem>>, %arg5: memref<1x32xf32, #tpu.memory_space<vmem>>, %arg6: memref<8x32xf32, #tpu.memory_space<vmem>>) attributes {dimension_semantics = [#tpu.dimension_semantics<parallel>], iteration_bounds = array<i64: 2>, scalar_prefetch = 0 : i64, scratch_operands = 0 : i64, tpu.core_type = #tpu.core_type<tc>, window_params = [{transform_indices = @transform_0, window_bounds = array<i64: 8, 32>}, {pipeline_mode = #tpu.pipeline_mode<synchronous>, transform_indices = @transform_1, window_bounds = array<i64: 32, 64>}, {pipeline_mode = #tpu.pipeline_mode<synchronous>, transform_indices = @transform_2, window_bounds = array<i64: 1, 64>}, {pipeline_mode = #tpu.pipeline_mode<synchronous>, transform_indices = @transform_3, window_bounds = array<i64: 64, 32>}, {pipeline_mode = #tpu.pipeline_mode<synchronous>, transform_indices = @transform_4, window_bounds = array<i64: 1, 32>}, {transform_indices = @transform_5, window_bounds = array<i64: 8, 32>}]} {
    %c0 = arith.constant 0 : index
    %c0_0 = arith.constant 0 : index
    %0 = vector.load %arg1[%c0, %c0_0] : memref<8x32xf32, #tpu.memory_space<vmem>>, vector<8x32xf32>
    %c0_1 = arith.constant 0 : index
    %c0_2 = arith.constant 0 : index
    %1 = vector.load %arg2[%c0_1, %c0_2] : memref<32x64xf32, #tpu.memory_space<vmem>>, vector<32x64xf32>
    %cst = arith.constant dense<0.000000e+00> : vector<8x64xf32>
    %2 = tpu.matmul %0, %1, %cst {dimension_numbers = #tpu.dot_dimension_numbers<[1], [0], [0], [1], [0, 0, 1, 1], [], []>} : vector<8x32xf32>, vector<32x64xf32>, vector<8x64xf32> -> vector<8x64xf32>
    %c0_3 = arith.constant 0 : index
    %c0_4 = arith.constant 0 : index
    %3 = vector.load %arg3[%c0_3, %c0_4] : memref<1x64xf32, #tpu.memory_space<vmem>>, vector<1x64xf32>
    %4 = vector.broadcast %3 : vector<1x64xf32> to vector<8x64xf32>
    %5 = arith.addf %2, %4 : vector<8x64xf32>
    %cst_5 = arith.constant 5.000000e-01 : f32
    %6 = vector.broadcast %cst_5 : f32 to vector<8x64xf32>
    %7 = arith.mulf %6, %5 : vector<8x64xf32>
    %cst_6 = arith.constant 0.707106769 : f32
    %8 = vector.broadcast %cst_6 : f32 to vector<8x64xf32>
    %9 = arith.mulf %5, %8 : vector<8x64xf32>
    %10 = math.erf %9 : vector<8x64xf32>
    %cst_7 = arith.constant 1.000000e+00 : f32
    %11 = vector.broadcast %cst_7 : f32 to vector<8x64xf32>
    %12 = arith.addf %11, %10 : vector<8x64xf32>
    %13 = arith.mulf %7, %12 : vector<8x64xf32>
    %c0_8 = arith.constant 0 : index
    %c0_9 = arith.constant 0 : index
    %14 = vector.load %arg4[%c0_8, %c0_9] : memref<64x32xf32, #tpu.memory_space<vmem>>, vector<64x32xf32>
    %cst_10 = arith.constant dense<0.000000e+00> : vector<8x32xf32>
    %15 = tpu.matmul %13, %14, %cst_10 {dimension_numbers = #tpu.dot_dimension_numbers<[1], [0], [0], [1], [0, 0, 1, 1], [], []>} : vector<8x64xf32>, vector<64x32xf32>, vector<8x32xf32> -> vector<8x32xf32>
    %c0_11 = arith.constant 0 : index
    %c0_12 = arith.constant 0 : index
    %16 = vector.load %arg5[%c0_11, %c0_12] : memref<1x32xf32, #tpu.memory_space<vmem>>, vector<1x32xf32>
    %17 = vector.broadcast %16 : vector<1x32xf32> to vector<8x32xf32>
    %18 = arith.addf %15, %17 : vector<8x32xf32>
    %c0_13 = arith.constant 0 : index
    %c0_14 = arith.constant 0 : index
    %19 = vector.load %arg6[%c0_13, %c0_14] : memref<8x32xf32, #tpu.memory_space<vmem>>, vector<8x32xf32>
    tpu.vector_store %arg6[%c0_13, %c0_14], %18 {strides = array<i32>} : memref<8x32xf32, #tpu.memory_space<vmem>>, vector<8x32xf32>,
    return
  }
  func.func @transform_0(%arg0: i32) -> (i32, i32) {
    %c0_i32 = arith.constant 0 : i32
    %c0_i32_0 = arith.constant 0 : i32
    return %arg0, %c0_i32 : i32, i32
  }
  func.func @transform_1(%arg0: i32) -> (i32, i32) {
    %c0_i32 = arith.constant 0 : i32
    %c0_i32_0 = arith.constant 0 : i32
    %c0_i32_1 = arith.constant 0 : i32
    return %c0_i32, %c0_i32_0 : i32, i32
  }
  func.func @transform_2(%arg0: i32) -> (i32, i32) {
    %c0_i32 = arith.constant 0 : i32
    %c0_i32_0 = arith.constant 0 : i32
    %c0_i32_1 = arith.constant 0 : i32
    return %c0_i32, %c0_i32_0 : i32, i32
  }
  func.func @transform_3(%arg0: i32) -> (i32, i32) {
    %c0_i32 = arith.constant 0 : i32
    %c0_i32_0 = arith.constant 0 : i32
    %c0_i32_1 = arith.constant 0 : i32
    return %c0_i32, %c0_i32_0 : i32, i32
  }
  func.func @transform_4(%arg0: i32) -> (i32, i32) {
    %c0_i32 = arith.constant 0 : i32
    %c0_i32_0 = arith.constant 0 : i32
    %c0_i32_1 = arith.constant 0 : i32
    return %c0_i32, %c0_i32_0 : i32, i32
  }
  func.func @transform_5(%arg0: i32) -> (i32, i32) {
    %c0_i32 = arith.constant 0 : i32
    %c0_i32_0 = arith.constant 0 : i32
    return %arg0, %c0_i32 : i32, i32
  }
}

</mosaic_0001>

<bundles_post_ra>
// kernel: mlp_forward.1
= control target key start
LH: loop header
LB: loop body
LE: loop exit
PB: predicated region body
PF: predicated region fallthrough
CT: control target
= control target key end

     0   :  { %10 = vsyncpa [#allocation3], 0  ;;  %s807_s0 = inlined_call_operand.vmem [shape: f32[16,32], index: 0, kind: input, shape index: {}]   ;;  %s808_s1 = inlined_call_operand.vmem [shape: f32[32,64], index: 1, kind: input, shape index: {}]   ;;  %s809_s2 = inlined_call_operand.vmem [shape: f32[1,64], index: 2, kind: input, shape index: {}]   ;;  %s810_s3 = inlined_call_operand.vmem [shape: f32[64,32], index: 3, kind: input, shape index: {}]   ;;  %s811_s4 = inlined_call_operand.vmem [shape: f32[1,32], index: 4, kind: input, shape index: {}]   ;;  %s812_s5 = inlined_call_operand.hbm [shape: f32[16,32], index: 5, kind: output, shape index: {}]  }
   0x1   :  { %12 = vsyncpa [#allocation3 + $0x1], 0  ;;  %s670_s18 = smov 0   ;;  %s672_s19 = smov 0  }
   0x2   :  { %s674_s20 = smov 0   ;;  %s676_s21 = smov 0  }
   0x3 LB: > { %s691_s22 = sadd.s32 4294967295, %s635_s21   ;;  %s474_s23 = sadd.s32 4294967294, %s635_s21   ;;  %s635_s21 = sphi %s676_s21, %s818_s21   ;;  %s631_s20 = sphi %s674_s20, %s817_s20   ;;  %s627_s19 = sphi %s672_s19, %s816_s19   ;;  %s623_s18 = sphi %s670_s18, %s815_s18  }
   0x4   : > { %s695_s24 = sadd.s32 1, %s635_s21   ;;  %s135_s25 = sadd.s32 1, %s631_s20 }
   0x5   : > { %s132_s26 = ssub.s32 %s635_s21, %s695_s24  ;;  %p145_p0 = scmp.ne.s32.totalorder %s631_s20, %s627_s19 }
   0x6   : > { %p133_p1 = scmp.eq.s32.totalorder %s132_s26, 0  ;;  %p146_p2 = scmp.eq.s32.totalorder %s691_s22, 1 }
   0x7   : > { %p151_p3 = scmp.ne.s32.totalorder %s627_s19, %s623_s18  ;;  %p152_p4 = scmp.eq.s32.totalorder %s474_s23, 1 }
   0x8   : > { %s706_s27 = scalar_select %p133_p1, %s631_s20, %s135_s25  }
   0x9   : > { %p708_p5 = por %p146_p2, %p145_p0  ;;  %p712_p6 = por %p152_p4, %p151_p3 }
   0xa   : > { %p477_p7 = scmp.ge.s32.totalorder %s635_s21, 1  ;;  %p189_p8 = scmp.lt.s32.totalorder %s635_s21, 3 }
   0xc   : > { %p190_p9 = pnand %p477_p7, %p189_p8 }
   0xd   : > { %p216_p10 = scmp.lt.s32.totalorder (!%p190_p9), %s691_s22, 1  ;;  %s213_s26 = sand.u32 (!%p190_p9), 1, %s627_s19  }
   0xe   : > { %193 = sbr.rel (%p190_p9) target bundleno = 451 (0x1c3), region = 40  ;;  %s478_s30 = sshll.u32 (!%p190_p9), %s213_s26, 3 }
   0xf   : > { %s485_s8 = sshll.u32 (!%p190_p9), %s691_s22, 7  ;;  %s402_s14 = scalar_lea.sflag (!%p190_p9), [#allocation3], %s213_s26 }
  0x10   : > { %s771_s13 = scalar_lea.hbm (!%p190_p9), %s812_s5, %s485_s8 }
  0x13   : > { %v224_v0 = vld [vmem:[%s808_s1 + $0x18] sm:$0xff]  ;;  %v637_v1 = vmov 0.0   ;;  %v223_v2 = vld [vmem:[%s808_s1 + $0x10] sm:$0xff]  ;;  %vm638_vm0 = vmmov 0   ;;  %s217_s9 = scalar_select %p216_p10, %s691_s22, 1  ;;  %v222_v3 = vld [vmem:[%s808_s1 + $0x8] sm:$0xff] }
  0x14   : > { %502 = vmatprep.subr.mxu0 %v637_v1  ;;  %510 = vmatprep.mubr.msk.f32.mxu0 %vm638_vm0, %v637_v1  ;;  %v221_v4 = vld [vmem:[%s808_s1] sm:$0xff]  ;;  %vm232_vm1 = vcmask 261120   ;;  %v318_v6 = vld [vmem:[%s810_s3 + $0x38] sm:$0xff]  ;;  %v317_v7 = vld [vmem:[%s810_s3 + $0x30] sm:$0xff]  ;;  %vm326_vm2 = vcmask 523264   ;;  %s639_s22 = smov [#allocation2]  }
  0x15   : > { %503 = vmatpush3.msra.mxu0 %v224_v0  ;;  %513 = vmatprep.subr.mxu1 %v637_v1  ;;  %s479_s12 = sshll.u32 %s217_s9, 3  ;;  %v316_v8 = vld [vmem:[%s810_s3 + $0x28] sm:$0xff]  ;;  %v315_v9 = vld [vmem:[%s810_s3 + $0x20] sm:$0xff]  ;;  %v314_v10 = vld [vmem:[%s810_s3 + $0x18] sm:$0xff]  ;;  %s215_s9 = scalar_lea.vmem [#allocation2], %s478_s30 }
  0x16   : > { %504 = vmatprep.subr.mxu0 %v637_v1  ;;  %529 = vmatprep.mubr.msk.f32.mxu1 %vm638_vm0, %v637_v1  ;;  %s219_s17 = scalar_lea.vmem %s807_s0, %s479_s12  ;;  %v313_v11 = vld [vmem:[%s810_s3 + $0x10] sm:$0xff]  ;;  %v312_v12 = vld [vmem:[%s810_s3 + $0x8] sm:$0xff]  ;;  %v311_v13 = vld [vmem:[%s810_s3] sm:$0xff]  ;;  %s415_s10 = sshll.u32 %s215_s9, 4  ;;  %s416_s10 = int_to_ptr.vmem [resolvable:$true] %s415_s10 }
  0x17   : > { %505 = vmatpush3.msra.mxu0 %v223_v2  ;;  %v220_v5 = vld [vmem:[%s219_s17] sm:$0xff]  ;;  %514 = vmatpush3.msra.mxu1 %v318_v6  ;;  %s575_s15 = scalar_lea.vmem %s416_s10, 128  ;;  %s579_s16 = sshll.u32 %s639_s22, 4  ;;  %s580_s16 = int_to_ptr.vmem [resolvable:$false] %s579_s16 }
  0x18   : > { %506 = vmatprep.subr.mxu0 %v637_v1  ;;  %515 = vmatprep.subr.mxu1 %v637_v1  ;;  %v480_v14 = vld [vmem:[%s809_s2] ss:$0 sm:$0xff]  ;;  %p576_p11 = scmp.ne.s32.totalorder %s416_s10, %s575_s15  ;;  %s581_s17 = scalar_lea.vmem %s580_s16, 256 }
  0x19   : > { %507 = vmatpush3.msra.mxu0 %v222_v3  ;;  %516 = vmatpush3.msra.mxu1 %v317_v7  ;;  %v482_v23 = vld [vmem:[%s811_s4] ss:$0 sm:$0xff]  ;;  %p582_p0 = scmp.lt.s32.totalorder %s416_s10, %s580_s16  ;;  %p583_p1 = scmp.lt.s32.totalorder %s581_s17, %s575_s15 }
  0x1a   : > { %508 = vmatprep.subr.mxu0 %v637_v1  ;;  %517 = vmatprep.subr.mxu1 %v637_v1  ;;  %p577_p12 = pnand %p576_p11, %p708_p5 }
  0x1b   : > { %509 = vmatpush3.msra.mxu0 %v221_v4  ;;  %518 = vmatpush3.msra.mxu1 %v316_v8  ;;  %p584_p2 = por %p583_p1, %p582_p0 }
  0x1c   : > { %511 = vmatmul.mubr.msk.f32.vlgmr.msra.gmra.mxu0 %vm232_vm1, %v220_v5  ;;  %519 = vmatprep.subr.mxu1 %v637_v1  ;;  %p578_p13 = pneg %p577_p12 }
  0x1d   : > { %520 = vmatpush3.msra.mxu1 %v315_v9 }
  0x1e   : > { %521 = vmatprep.subr.mxu1 %v637_v1  ;;  %p585_p3 = pnand %p584_p2, %p578_p13 }
  0x1f   : > { %522 = vmatpush3.msra.mxu1 %v314_v10 }
  0x20   : > { %523 = vmatprep.subr.mxu1 %v637_v1 }
  0x21   : > { %524 = vmatpush3.msra.mxu1 %v313_v11 }
  0x22   : > { %525 = vmatprep.subr.mxu1 %v637_v1 }
  0x23   : > { %526 = vmatpush3.msra.mxu1 %v312_v12 }
  0x24   : > { %527 = vmatprep.subr.mxu1 %v637_v1 }
  0x25   : > { %528 = vmatpush3.msra.mxu1 %v311_v13 }
  0xdc   : > { %v302_v15 = vpop.f32.mrf.mxu0 }
  0xdd   : > { %v303_v16 = vadd.f32 %v480_v14, %v302_v15 }
  0xde   : > { %v512_v17 = vpop.f32.mrf.mxu0 }
  0xdf   : > { %v307_v18 = vmul.f32 0.70710677, %v303_v16  ;;  %v306_v20 = vmul.f32 0.5, %v303_v16 }
  0xe1   : > { %573 = verf.f32 %v307_v18 }
  0xee   : > { %v574_v19 = vpop.eup %573 }
  0xef   : > { %v309_v21 = vadd.f32 1.0, %v574_v19 }
  0xf1   : > { %v310_v22 = vmul.f32 %v309_v21, %v306_v20 }
  0xf3   : > { %530 = vmatmul.mubr.msk.f32.vlgmr.msra.gmra.mxu1 %vm326_vm2, %v310_v22 }
 0x1b3   : > { %v396_v24 = vpop.f32.mrf.mxu1 }
 0x1b4   : > { %v397_v25 = vadd.f32 %v482_v23, %v396_v24 }
 0x1b5   : > { %v531_v26 = vpop.f32.mrf.mxu1 }
 0x1b6   : > { %400 = vst.msk [vmem:[%s215_s9] sm:$0xff] %vm232_vm1, %v397_v25 }
 0x1b7   : > { %588 = shalt.err (!%p585_p3)
}
 0x1b8   : > { %s589_s23 = scalar_lea.hbm %s771_s13, 128  ;;  %s593_s30 = scalar_lea.hbm %s812_s5, 256 }
 0x1b9   : > { %p590_p4 = scmp.ne.s32.totalorder %s771_s13, %s589_s23  ;;  %p594_p9 = scmp.lt.s32.totalorder %s771_s13, %s812_s5 }
 0x1ba   : > { %p595_p10 = scmp.lt.s32.totalorder %s593_s30, %s589_s23 }
 0x1bb   : > { %p591_p7 = pnand %p590_p4, %p708_p5 }
 0x1bc   : > { %p596_p11 = por %p595_p10, %p594_p9 }
 0x1bd   : > { %p592_p8 = pneg %p591_p7 }
 0x1bf   : > { %p597_p12 = pnand %p596_p11, %p592_p8 }
 0x1c1   : > { %600 = shalt.err (!%p597_p12)
}
 0x1c2   : > { %532 = dma.vmem_to_hbm [thread:$0]  (%p708_p5), %s416_s10, 128, %s771_s13, %s402_s14  }
 0x1c3 PF: > { %p538_p13 = scmp.ge.s32.totalorder %s635_s21, 2  ;;  %s427_s8 = sand.u32 1, %s623_s18  }
 0x1c4   : > { %s428_s9 = scalar_lea.sflag [#allocation3], %s427_s8 }
 0x1c5   : > { %p535_p0 = pnand %p538_p13, %p712_p6 }
 0x1c7   : > { %p536_p1 = pneg %p535_p0 }
 0x1c9   : > { %618 = dma.done.wait (%p536_p1), %s428_s9, 128  }
 0x1ca   : > { %620 = vsyncadd (%p536_p1), %s428_s9, 4294967168  ;;  %p15_p2 = scmp.ge.s32.totalorder %s695_s24, 4   ;;  %s815_s18 = smov %s627_s19 }
 0x1cb   : > { %s816_s19 = smov %s631_s20  ;;  %s817_s20 = smov %s706_s27 }
 0x1cc   : > { %s818_s21 = smov %s695_s24  ;;  %17 = sbr.rel (!%p15_p2) target bundleno = 3 (0x3), region = 75 }
 0x1d1   :  { %433 = vsyncpa [#allocation3], 1 }
 0x1d2   :  { %435 = vsyncpa [#allocation3 + $0x1], 1 }

</bundles_post_ra>
